<compile_context>
chip_gen: v5e
topology: v5e:2x2
jax: 0.10.0
libtpu: 0.0.40
codegen_flags: <defaults>
</compile_context>

<pallas_src>
import jax
import jax.numpy as jnp
from jax.experimental import pallas as pl
from jax.experimental.pallas import tpu as pltpu

# ----------------------------- configuration -------------------------------
HIDDEN = 32        # hidden_size
EMB = 32           # embedding_size
VOCAB = 20         # input_size
OUT = 16           # output_size
N_LAYERS = 2
BATCH = 2
MAX_LEN = 8

G = 3 * HIDDEN     # GRU gate width (r|z|n) = 96
LANES = 128        # packed-slab lane width == fused-dot output width
OUT_LANES = 2 * LANES  # merged output slab width (logits | hidden | pad)

# Row offsets of each pre-transposed block inside the packed weight slab.
ROW_ENC = 0                       # wa_e^T              (H, H)
ROW_H1 = ROW_ENC + HIDDEN         # [whh1^T | wa_h^T]   (H, 128)
ROW_CTX = ROW_H1 + HIDDEN         # [wih0_c^T | wc_c^T] (H, 128)
ROW_EMB = ROW_CTX + HIDDEN        # wih0_e^T            (E, 3H)
ROW_HH0 = ROW_EMB + EMB           # whh0^T              (H, 3H)
ROW_IH1 = ROW_HH0 + HIDDEN        # wih1^T              (H, 3H)
ROW_CR = ROW_IH1 + HIDDEN         # wc_r^T              (H, H)
ROW_OUT = ROW_CR + HIDDEN         # wo^T                (H, OUT), zero padded
ROW_B_H1 = ROW_OUT + HIDDEN       # [bhh1 | ba]
ROW_B_CTX = ROW_B_H1 + 1          # [bih0 | bc]
ROW_B_HH0 = ROW_B_CTX + 1         # bhh0
ROW_B_IH1 = ROW_B_HH0 + 1         # bih1
ROW_B_OUT = ROW_B_IH1 + 1         # bo (zero padded)
ROW_WS = ROW_B_OUT + 1            # attn score weight (1, H)
SLAB_ROWS = ((ROW_WS + 1 + 7) // 8) * 8


def _sigmoid(x):
    return 1.0 / (1.0 + jnp.exp(-x))


# ------------------------------- the kernel --------------------------------
def decoder_kernel(emb_ref, hid_ref, enc_ref, nmask_ref, w_ref, out_ref):
    H = HIDDEN
    B, L, _ = enc_ref.shape

    emb = emb_ref[...]                      # (B, E)   embedded tokens (eval dropout)
    hid = hid_ref[...]                      # (B, 2H)  [h0 | h1] lane-concat
    h0 = hid[:, :H]                         # (B, H)   layer-0 hidden
    h1 = hid[:, H:]                         # (B, H)   layer-1 (top) hidden
    enc = enc_ref[...]                      # (B, L, H)
    nmask = nmask_ref[...]                  # (B, L)   additive mask (0 / -1e12)

    # Static views into the packed, pre-transposed weight slab (free).
    w_enc = w_ref[ROW_ENC:ROW_ENC + H, :H]
    w_h1 = w_ref[ROW_H1:ROW_H1 + H, :]
    w_ctx = w_ref[ROW_CTX:ROW_CTX + H, :]
    w_emb = w_ref[ROW_EMB:ROW_EMB + EMB, :G]
    w_hh0 = w_ref[ROW_HH0:ROW_HH0 + H, :G]
    w_ih1 = w_ref[ROW_IH1:ROW_IH1 + H, :G]
    w_cr = w_ref[ROW_CR:ROW_CR + H, :H]
    w_out = w_ref[ROW_OUT:ROW_OUT + H, :]
    b_h1 = w_ref[ROW_B_H1:ROW_B_H1 + 1, :]
    b_ctx = w_ref[ROW_B_CTX:ROW_B_CTX + 1, :]
    b_hh0 = w_ref[ROW_B_HH0:ROW_B_HH0 + 1, :G]
    b_ih1 = w_ref[ROW_B_IH1:ROW_B_IH1 + 1, :G]
    b_out = w_ref[ROW_B_OUT:ROW_B_OUT + 1, :]
    ws = w_ref[ROW_WS:ROW_WS + 1, :H]       # (1, H)

    # Fused shared-LHS dot on h1: [gh1 (3H) | hid_proj (H)], biases folded in.
    f_h1 = jnp.dot(h1, w_h1, preferred_element_type=jnp.float32) + b_h1  # (B,128)
    gh1 = f_h1[:, :G]                       # h1 @ whh1^T + bhh1
    hid_proj = f_h1[:, G:]                  # h1 @ wa_h^T + ba

    # ----------------------- attention (Attn module) -----------------------
    enc_proj = jnp.dot(enc.reshape(B * L, H), w_enc,
                       preferred_element_type=jnp.float32)               # (BL, H)
    energy = jnp.tanh(enc_proj.reshape(B, L, H) + hid_proj[:, None, :])  # (B, L, H)
    scores = jnp.sum(energy * ws[None], axis=2) + nmask                  # (B, L)
    scores = scores - jnp.max(scores, axis=1, keepdims=True)
    ex = jnp.exp(scores)
    attn_w = ex * pl.reciprocal(jnp.sum(ex, axis=1, keepdims=True), approx=True)
    context = jnp.sum(attn_w[:, :, None] * enc, axis=1)                  # (B, H)

    # Fused shared-LHS dot on context: [gi0_ctx (3H) | hc_ctx (H)], biases folded.
    f_ctx = jnp.dot(context, w_ctx, preferred_element_type=jnp.float32) + b_ctx
    gi0 = f_ctx[:, :G] + jnp.dot(emb, w_emb, preferred_element_type=jnp.float32)
    hc_ctx = f_ctx[:, G:]                   # context @ wc_c^T + bc

    # ------------------------------ GRU layer 0 ------------------------------
    gh0 = jnp.dot(h0, w_hh0, preferred_element_type=jnp.float32) + b_hh0
    r0 = _sigmoid(gi0[:, :H] + gh0[:, :H])
    z0 = _sigmoid(gi0[:, H:2 * H] + gh0[:, H:2 * H])
    n0 = jnp.tanh(gi0[:, 2 * H:] + r0 * gh0[:, 2 * H:])
    h0_new = (1.0 - z0) * n0 + z0 * h0
    # TODO(synk): inter-layer GRU dropout (p=0.5) is train-time only; identity here.

    # ------------------------------ GRU layer 1 ------------------------------
    gi1 = jnp.dot(h0_new, w_ih1, preferred_element_type=jnp.float32) + b_ih1
    r1 = _sigmoid(gi1[:, :H] + gh1[:, :H])
    z1 = _sigmoid(gi1[:, H:2 * H] + gh1[:, H:2 * H])
    n1 = jnp.tanh(gi1[:, 2 * H:] + r1 * gh1[:, 2 * H:])
    h1_new = (1.0 - z1) * n1 + z1 * h1      # rnn_output

    # ------------------------------ output head ------------------------------
    hc = jnp.tanh(jnp.dot(h1_new, w_cr, preferred_element_type=jnp.float32) + hc_ctx)
    # w_out / b_out are zero-padded past OUT lanes -> logits slab is (B, 128).
    logits = jnp.dot(hc, w_out, preferred_element_type=jnp.float32) + b_out

    # Single merged lane-dense (B, 256) store: [logits | h0_new | h1_new | pad].
    out_ref[...] = jnp.concatenate(
        [logits, h0_new, h1_new,
         jnp.zeros((B, OUT_LANES - LANES - 2 * H), jnp.float32)], axis=1)


# ------------------------------ param setup --------------------------------
def init_params(key):
    def uniform(key, shape, fan_in):
        k = 1.0 / jnp.sqrt(jnp.float32(fan_in))
        return jax.random.uniform(key, shape, jnp.float32, -k, k)

    keys = jax.random.split(key, 20)
    p = {}
    emb_tab = jax.random.normal(keys[0], (VOCAB, EMB), jnp.float32) * 0.1
    p["embedding"] = emb_tab.at[0].set(0.0)                         # padding_idx=0
    p["wa"] = uniform(keys[1], (HIDDEN, 2 * HIDDEN), 2 * HIDDEN)    # attn.attn.weight
    p["ba"] = uniform(keys[2], (1, HIDDEN), 2 * HIDDEN)             # attn.attn.bias
    p["ws"] = uniform(keys[3], (1, HIDDEN), HIDDEN)                 # attn.score.weight
    p["wih0"] = uniform(keys[4], (3 * HIDDEN, EMB + HIDDEN), HIDDEN)
    p["whh0"] = uniform(keys[5], (3 * HIDDEN, HIDDEN), HIDDEN)
    p["bih0"] = uniform(keys[6], (1, 3 * HIDDEN), HIDDEN)
    p["bhh0"] = uniform(keys[7], (1, 3 * HIDDEN), HIDDEN)
    p["wih1"] = uniform(keys[8], (3 * HIDDEN, HIDDEN), HIDDEN)
    p["whh1"] = uniform(keys[9], (3 * HIDDEN, HIDDEN), HIDDEN)
    p["bih1"] = uniform(keys[10], (1, 3 * HIDDEN), HIDDEN)
    p["bhh1"] = uniform(keys[11], (1, 3 * HIDDEN), HIDDEN)
    p["wc"] = uniform(keys[12], (HIDDEN, 2 * HIDDEN), 2 * HIDDEN)
    p["bc"] = uniform(keys[13], (1, HIDDEN), 2 * HIDDEN)
    p["wo"] = uniform(keys[14], (OUT, HIDDEN), HIDDEN)
    p["bo"] = uniform(keys[15], (1, OUT), HIDDEN)
    return p


def pack_weights(p):
    """Pre-transpose, fuse (shared-LHS) and pack all weights/biases into one
    (SLAB_ROWS, 128) f32 slab -> a single kernel input / single DMA. Done once
    per model, reused for every decode step."""
    H, E = HIDDEN, EMB

    def pad_lanes(x):
        return jnp.pad(x, ((0, 0), (0, LANES - x.shape[1])))

    wa_h, wa_e = p["wa"][:, :H], p["wa"][:, H:]           # attn.attn (hidden|enc)
    wih0_e, wih0_c = p["wih0"][:, :E], p["wih0"][:, E:]   # gru l0 (embedded|context)
    wc_r, wc_c = p["wc"][:, :H], p["wc"][:, H:]           # concat (rnn_out|context)

    blocks = [
        pad_lanes(wa_e.T),                                    # ROW_ENC
        jnp.concatenate([p["whh1"].T, wa_h.T], axis=1),       # ROW_H1
        jnp.concatenate([wih0_c.T, wc_c.T], axis=1),          # ROW_CTX
        pad_lanes(wih0_e.T),                                  # ROW_EMB
        pad_lanes(p["whh0"].T),                               # ROW_HH0
        pad_lanes(p["wih1"].T),                               # ROW_IH1
        pad_lanes(wc_r.T),                                    # ROW_CR
        pad_lanes(p["wo"].T),                                 # ROW_OUT
        jnp.concatenate([p["bhh1"], p["ba"]], axis=1),        # ROW_B_H1
        jnp.concatenate([p["bih0"], p["bc"]], axis=1),        # ROW_B_CTX
        pad_lanes(p["bhh0"]),                                 # ROW_B_HH0
        pad_lanes(p["bih1"]),                                 # ROW_B_IH1
        pad_lanes(p["bo"]),                                   # ROW_B_OUT
        pad_lanes(p["ws"]),                                   # ROW_WS
    ]
    slab = jnp.concatenate(blocks, axis=0)
    return jnp.pad(slab, ((0, SLAB_ROWS - slab.shape[0]), (0, 0)))


# ------------------------------ kernel wrapper ------------------------------
@jax.jit
def attn_decoder_forward(w_slab, emb_table, input_seq, last_hidden,
                         encoder_outputs, seq_mask):
    B = input_seq.shape[0]
    H = HIDDEN
    # glue: embedding gather; em_dropout is identity in eval mode.
    embedded = jnp.take(emb_table, input_seq, axis=0)              # (B, E)
    # glue: layout plumbing only (tiny arrays, done once per call).
    enc_blh = jnp.transpose(encoder_outputs, (1, 0, 2))            # (B, L, H)
    neg_mask = seq_mask.astype(jnp.float32) * jnp.float32(-1e12)   # (B, L)
    hid_in = jnp.concatenate([last_hidden[0], last_hidden[1]], axis=1)  # (B, 2H)

    vmem = lambda: pl.BlockSpec(memory_space=pltpu.MemorySpace.VMEM)
    slab = pl.pallas_call(
        decoder_kernel,
        out_shape=jax.ShapeDtypeStruct((B, OUT_LANES), jnp.float32),
        in_specs=[vmem() for _ in range(5)],
        out_specs=vmem(),
    )(embedded, hid_in, enc_blh, neg_mask, w_slab)

    output = slab[:, :OUT]
    hidden = jnp.stack([slab[:, LANES:LANES + H],
                        slab[:, LANES + H:LANES + 2 * H]], axis=0)
    return output, hidden


# --------------------------- pure-JAX reference -----------------------------
def reference_forward(params, input_seq, last_hidden, encoder_outputs, seq_mask):
    H = HIDDEN
    embedded = jnp.take(params["embedding"], input_seq, axis=0)    # (B, E)
    h0, h1 = last_hidden[0], last_hidden[1]
    L, B, _ = encoder_outputs.shape

    hidden_rep = jnp.tile(h1[None, :, :], (L, 1, 1))               # (L, B, H)
    energy_in = jnp.concatenate([hidden_rep, encoder_outputs], axis=2).reshape(-1, 2 * H)
    e = jnp.tanh(energy_in @ params["wa"].T + params["ba"][0])
    scores = (e @ params["ws"].T)[:, 0].reshape(L, B).T            # (B, L)
    scores = jnp.where(seq_mask, -1e12, scores)
    attn_w = jax.nn.softmax(scores, axis=1)                        # (B, L)
    context = jnp.einsum("bl,lbh->bh", attn_w, encoder_outputs)    # (B, H)

    def gru_cell(x, h, wih, whh, bih, bhh):
        gi = x @ wih.T + bih[0]
        gh = h @ whh.T + bhh[0]
        r = jax.nn.sigmoid(gi[:, :H] + gh[:, :H])
        z = jax.nn.sigmoid(gi[:, H:2 * H] + gh[:, H:2 * H])
        n = jnp.tanh(gi[:, 2 * H:] + r * gh[:, 2 * H:])
        return (1.0 - z) * n + z * h

    x0 = jnp.concatenate([embedded, context], axis=1)
    h0n = gru_cell(x0, h0, params["wih0"], params["whh0"], params["bih0"], params["bhh0"])
    h1n = gru_cell(h0n, h1, params["wih1"], params["whh1"], params["bih1"], params["bhh1"])

    cc = jnp.concatenate([h1n, context], axis=1)
    out = jnp.tanh(cc @ params["wc"].T + params["bc"][0]) @ params["wo"].T + params["bo"][0]
    return out, jnp.stack([h0n, h1n], axis=0)


# ---------------------------------- main ------------------------------------
if __name__ == "__main__":
    key = jax.random.PRNGKey(0)
    kp, k1, k2, k3 = jax.random.split(key, 4)

    params = init_params(kp)
    w_slab = jax.block_until_ready(pack_weights(params))   # pack once, reuse per step

    input_seq = jax.random.randint(k1, (BATCH,), 1, VOCAB, dtype=jnp.int32)
    last_hidden = jax.random.normal(k2, (N_LAYERS, BATCH, HIDDEN), jnp.float32)
    encoder_outputs = jax.random.normal(k3, (MAX_LEN, BATCH, HIDDEN), jnp.float32)
    lengths = jnp.array([MAX_LEN, MAX_LEN - 3], dtype=jnp.int32)
    seq_mask = jnp.arange(MAX_LEN)[None, :] >= lengths[:, None]    # (B, L) bool

    out, hidden = attn_decoder_forward(w_slab, params["embedding"], input_seq,
                                       last_hidden, encoder_outputs, seq_mask)
    jax.block_until_ready((out, hidden))

    ref_out, ref_hidden = reference_forward(params, input_seq, last_hidden,
                                            encoder_outputs, seq_mask)
    # approx=True softmax reciprocal -> compare at 2e-3 instead of 1e-4.
    assert jnp.allclose(out, ref_out, atol=2e-3, rtol=2e-3), "output mismatch"
    assert jnp.allclose(hidden, ref_hidden, atol=2e-3, rtol=2e-3), "hidden mismatch"

    print("KERNEL_OK")
</pallas_src>

<mosaic_0001>
module attributes {stable_mosaic.version = 11 : i64} {
  func.func @decoder_kernel(%arg0: memref<2x32xf32, #tpu.memory_space<vmem>>, %arg1: memref<2x64xf32, #tpu.memory_space<vmem>>, %arg2: memref<2x8x32xf32, #tpu.memory_space<vmem>>, %arg3: memref<2x8xf32, #tpu.memory_space<vmem>>, %arg4: memref<264x128xf32, #tpu.memory_space<vmem>>, %arg5: memref<2x256xf32, #tpu.memory_space<vmem>>) attributes {dimension_semantics = [], scalar_prefetch = 0 : i64, scratch_operands = 0 : i64, tpu.core_type = #tpu.core_type<tc>} {
    %c0 = arith.constant 0 : index
    %c0_0 = arith.constant 0 : index
    %0 = vector.load %arg0[%c0, %c0_0] : memref<2x32xf32, #tpu.memory_space<vmem>>, vector<2x32xf32>
    %c0_1 = arith.constant 0 : index
    %c0_2 = arith.constant 0 : index
    %1 = vector.load %arg1[%c0_1, %c0_2] : memref<2x64xf32, #tpu.memory_space<vmem>>, vector<2x64xf32>
    %2 = vector.extract_strided_slice %1 {offsets = [0, 0], sizes = [2, 32], strides = [1, 1]} : vector<2x64xf32> to vector<2x32xf32>
    %3 = vector.extract_strided_slice %1 {offsets = [0, 32], sizes = [2, 32], strides = [1, 1]} : vector<2x64xf32> to vector<2x32xf32>
    %c0_3 = arith.constant 0 : index
    %c0_4 = arith.constant 0 : index
    %c0_5 = arith.constant 0 : index
    %4 = vector.load %arg2[%c0_3, %c0_4, %c0_5] : memref<2x8x32xf32, #tpu.memory_space<vmem>>, vector<2x8x32xf32>
    %c0_6 = arith.constant 0 : index
    %c0_7 = arith.constant 0 : index
    %5 = vector.load %arg3[%c0_6, %c0_7] : memref<2x8xf32, #tpu.memory_space<vmem>>, vector<2x8xf32>
    %c0_8 = arith.constant 0 : index
    %c0_9 = arith.constant 0 : index
    %6 = vector.load %arg4[%c0_8, %c0_9] : memref<264x128xf32, #tpu.memory_space<vmem>>, vector<32x32xf32>
    %c32 = arith.constant 32 : index
    %c0_10 = arith.constant 0 : index
    %7 = vector.load %arg4[%c32, %c0_10] : memref<264x128xf32, #tpu.memory_space<vmem>>, vector<32x128xf32>
    %c64 = arith.constant 64 : index
    %c0_11 = arith.constant 0 : index
    %8 = vector.load %arg4[%c64, %c0_11] : memref<264x128xf32, #tpu.memory_space<vmem>>, vector<32x128xf32>
    %c96 = arith.constant 96 : index
    %c0_12 = arith.constant 0 : index
    %9 = vector.load %arg4[%c96, %c0_12] : memref<264x128xf32, #tpu.memory_space<vmem>>, vector<32x96xf32>
    %c128 = arith.constant 128 : index
    %c0_13 = arith.constant 0 : index
    %10 = vector.load %arg4[%c128, %c0_13] : memref<264x128xf32, #tpu.memory_space<vmem>>, vector<32x96xf32>
    %c160 = arith.constant 160 : index
    %c0_14 = arith.constant 0 : index
    %11 = vector.load %arg4[%c160, %c0_14] : memref<264x128xf32, #tpu.memory_space<vmem>>, vector<32x96xf32>
    %c192 = arith.constant 192 : index
    %c0_15 = arith.constant 0 : index
    %12 = vector.load %arg4[%c192, %c0_15] : memref<264x128xf32, #tpu.memory_space<vmem>>, vector<32x32xf32>
    %c224 = arith.constant 224 : index
    %c0_16 = arith.constant 0 : index
    %13 = vector.load %arg4[%c224, %c0_16] : memref<264x128xf32, #tpu.memory_space<vmem>>, vector<32x128xf32>
    %c256 = arith.constant 256 : index
    %c0_17 = arith.constant 0 : index
    %14 = vector.load %arg4[%c256, %c0_17] : memref<264x128xf32, #tpu.memory_space<vmem>>, vector<1x128xf32>
    %c257 = arith.constant 257 : index
    %c0_18 = arith.constant 0 : index
    %15 = vector.load %arg4[%c257, %c0_18] : memref<264x128xf32, #tpu.memory_space<vmem>>, vector<1x128xf32>
    %c258 = arith.constant 258 : index
    %c0_19 = arith.constant 0 : index
    %16 = vector.load %arg4[%c258, %c0_19] : memref<264x128xf32, #tpu.memory_space<vmem>>, vector<1x96xf32>
    %c259 = arith.constant 259 : index
    %c0_20 = arith.constant 0 : index
    %17 = vector.load %arg4[%c259, %c0_20] : memref<264x128xf32, #tpu.memory_space<vmem>>, vector<1x96xf32>
    %c260 = arith.constant 260 : index
    %c0_21 = arith.constant 0 : index
    %18 = vector.load %arg4[%c260, %c0_21] : memref<264x128xf32, #tpu.memory_space<vmem>>, vector<1x128xf32>
    %c261 = arith.constant 261 : index
    %c0_22 = arith.constant 0 : index
    %19 = vector.load %arg4[%c261, %c0_22] : memref<264x128xf32, #tpu.memory_space<vmem>>, vector<1x32xf32>
    %cst = arith.constant dense<0.000000e+00> : vector<2x128xf32>
    %20 = tpu.matmul %3, %7, %cst {dimension_numbers = #tpu.dot_dimension_numbers<[1], [0], [0], [1], [0, 0, 1, 1], [], []>} : vector<2x32xf32>, vector<32x128xf32>, vector<2x128xf32> -> vector<2x128xf32>
    %21 = vector.broadcast %14 : vector<1x128xf32> to vector<2x128xf32>
    %22 = arith.addf %20, %21 : vector<2x128xf32>
    %23 = vector.extract_strided_slice %22 {offsets = [0, 0], sizes = [2, 96], strides = [1, 1]} : vector<2x128xf32> to vector<2x96xf32>
    %24 = vector.extract_strided_slice %22 {offsets = [0, 96], sizes = [2, 32], strides = [1, 1]} : vector<2x128xf32> to vector<2x32xf32>
    %25 = vector.shape_cast %4 : vector<2x8x32xf32> to vector<16x32xf32>
    %cst_23 = arith.constant dense<0.000000e+00> : vector<16x32xf32>
    %26 = tpu.matmul %25, %6, %cst_23 {dimension_numbers = #tpu.dot_dimension_numbers<[1], [0], [0], [1], [0, 0, 1, 1], [], []>} : vector<16x32xf32>, vector<32x32xf32>, vector<16x32xf32> -> vector<16x32xf32>
    %27 = vector.shape_cast %26 : vector<16x32xf32> to vector<2x8x32xf32>
    %28 = vector.shape_cast %24 : vector<2x32xf32> to vector<2x1x32xf32>
    %29 = vector.broadcast %28 : vector<2x1x32xf32> to vector<2x8x32xf32>
    %30 = arith.addf %27, %29 : vector<2x8x32xf32>
    %31 = math.tanh %30 : vector<2x8x32xf32>
    %32 = vector.shape_cast %19 : vector<1x32xf32> to vector<1x1x32xf32>
    %33 = vector.broadcast %32 : vector<1x1x32xf32> to vector<2x8x32xf32>
    %34 = arith.mulf %31, %33 : vector<2x8x32xf32>
    %cst_24 = arith.constant dense<0.000000e+00> : vector<2x8xf32>
    %35 = vector.multi_reduction <add>, %34, %cst_24 [2] : vector<2x8x32xf32> to vector<2x8xf32>
    %36 = arith.addf %35, %5 : vector<2x8xf32>
    %cst_25 = arith.constant dense<0xFF800000> : vector<2xf32>
    %37 = vector.multi_reduction <maximumf>, %36, %cst_25 [1] : vector<2x8xf32> to vector<2xf32>
    %38 = vector.shape_cast %37 : vector<2xf32> to vector<2x1xf32>
    %39 = vector.broadcast %38 : vector<2x1xf32> to vector<2x8xf32>
    %40 = arith.subf %36, %39 : vector<2x8xf32>
    %41 = math.exp %40 : vector<2x8xf32>
    %cst_26 = arith.constant dense<0.000000e+00> : vector<2xf32>
    %42 = vector.multi_reduction <add>, %41, %cst_26 [1] : vector<2x8xf32> to vector<2xf32>
    %43 = vector.shape_cast %42 : vector<2xf32> to vector<2x1xf32>
    %44 = tpu.reciprocal %43 {approx = true} : vector<2x1xf32> -> vector<2x1xf32>
    %45 = vector.broadcast %44 : vector<2x1xf32> to vector<2x8xf32>
    %46 = arith.mulf %41, %45 : vector<2x8xf32>
    %47 = vector.shape_cast %46 : vector<2x8xf32> to vector<2x8x1xf32>
    %48 = vector.broadcast %47 : vector<2x8x1xf32> to vector<2x8x32xf32>
    %49 = arith.mulf %48, %4 : vector<2x8x32xf32>
    %cst_27 = arith.constant dense<0.000000e+00> : vector<2x32xf32>
    %50 = vector.multi_reduction <add>, %49, %cst_27 [1] : vector<2x8x32xf32> to vector<2x32xf32>
    %cst_28 = arith.constant dense<0.000000e+00> : vector<2x128xf32>
    %51 = tpu.matmul %50, %8, %cst_28 {dimension_numbers = #tpu.dot_dimension_numbers<[1], [0], [0], [1], [0, 0, 1, 1], [], []>} : vector<2x32xf32>, vector<32x128xf32>, vector<2x128xf32> -> vector<2x128xf32>
    %52 = vector.broadcast %15 : vector<1x128xf32> to vector<2x128xf32>
    %53 = arith.addf %51, %52 : vector<2x128xf32>
    %54 = vector.extract_strided_slice %53 {offsets = [0, 0], sizes = [2, 96], strides = [1, 1]} : vector<2x128xf32> to vector<2x96xf32>
    %cst_29 = arith.constant dense<0.000000e+00> : vector<2x96xf32>
    %55 = tpu.matmul %0, %9, %cst_29 {dimension_numbers = #tpu.dot_dimension_numbers<[1], [0], [0], [1], [0, 0, 1, 1], [], []>} : vector<2x32xf32>, vector<32x96xf32>, vector<2x96xf32> -> vector<2x96xf32>
    %56 = arith.addf %54, %55 : vector<2x96xf32>
    %57 = vector.extract_strided_slice %53 {offsets = [0, 96], sizes = [2, 32], strides = [1, 1]} : vector<2x128xf32> to vector<2x32xf32>
    %cst_30 = arith.constant dense<0.000000e+00> : vector<2x96xf32>
    %58 = tpu.matmul %2, %10, %cst_30 {dimension_numbers = #tpu.dot_dimension_numbers<[1], [0], [0], [1], [0, 0, 1, 1], [], []>} : vector<2x32xf32>, vector<32x96xf32>, vector<2x96xf32> -> vector<2x96xf32>
    %59 = vector.broadcast %16 : vector<1x96xf32> to vector<2x96xf32>
    %60 = arith.addf %58, %59 : vector<2x96xf32>
    %61 = vector.extract_strided_slice %56 {offsets = [0, 0], sizes = [2, 32], strides = [1, 1]} : vector<2x96xf32> to vector<2x32xf32>
    %62 = vector.extract_strided_slice %60 {offsets = [0, 0], sizes = [2, 32], strides = [1, 1]} : vector<2x96xf32> to vector<2x32xf32>
    %63 = arith.addf %61, %62 : vector<2x32xf32>
    %cst_31 = arith.constant 0.000000e+00 : f32
    %64 = vector.broadcast %cst_31 : f32 to vector<2x32xf32>
    %65 = arith.subf %64, %63 : vector<2x32xf32>
    %66 = math.exp %65 : vector<2x32xf32>
    %cst_32 = arith.constant 1.000000e+00 : f32
    %67 = vector.broadcast %cst_32 : f32 to vector<2x32xf32>
    %68 = arith.addf %67, %66 : vector<2x32xf32>
    %cst_33 = arith.constant 1.000000e+00 : f32
    %69 = vector.broadcast %cst_33 : f32 to vector<2x32xf32>
    %70 = arith.divf %69, %68 : vector<2x32xf32>
    %71 = vector.extract_strided_slice %56 {offsets = [0, 32], sizes = [2, 32], strides = [1, 1]} : vector<2x96xf32> to vector<2x32xf32>
    %72 = vector.extract_strided_slice %60 {offsets = [0, 32], sizes = [2, 32], strides = [1, 1]} : vector<2x96xf32> to vector<2x32xf32>
    %73 = arith.addf %71, %72 : vector<2x32xf32>
    %cst_34 = arith.constant 0.000000e+00 : f32
    %74 = vector.broadcast %cst_34 : f32 to vector<2x32xf32>
    %75 = arith.subf %74, %73 : vector<2x32xf32>
    %76 = math.exp %75 : vector<2x32xf32>
    %cst_35 = arith.constant 1.000000e+00 : f32
    %77 = vector.broadcast %cst_35 : f32 to vector<2x32xf32>
    %78 = arith.addf %77, %76 : vector<2x32xf32>
    %cst_36 = arith.constant 1.000000e+00 : f32
    %79 = vector.broadcast %cst_36 : f32 to vector<2x32xf32>
    %80 = arith.divf %79, %78 : vector<2x32xf32>
    %81 = vector.extract_strided_slice %56 {offsets = [0, 64], sizes = [2, 32], strides = [1, 1]} : vector<2x96xf32> to vector<2x32xf32>
    %82 = vector.extract_strided_slice %60 {offsets = [0, 64], sizes = [2, 32], strides = [1, 1]} : vector<2x96xf32> to vector<2x32xf32>
    %83 = arith.mulf %70, %82 : vector<2x32xf32>
    %84 = arith.addf %81, %83 : vector<2x32xf32>
    %85 = math.tanh %84 : vector<2x32xf32>
    %cst_37 = arith.constant 1.000000e+00 : f32
    %86 = vector.broadcast %cst_37 : f32 to vector<2x32xf32>
    %87 = arith.subf %86, %80 : vector<2x32xf32>
    %88 = arith.mulf %87, %85 : vector<2x32xf32>
    %89 = arith.mulf %80, %2 : vector<2x32xf32>
    %90 = arith.addf %88, %89 : vector<2x32xf32>
    %cst_38 = arith.constant dense<0.000000e+00> : vector<2x96xf32>
    %91 = tpu.matmul %90, %11, %cst_38 {dimension_numbers = #tpu.dot_dimension_numbers<[1], [0], [0], [1], [0, 0, 1, 1], [], []>} : vector<2x32xf32>, vector<32x96xf32>, vector<2x96xf32> -> vector<2x96xf32>
    %92 = vector.broadcast %17 : vector<1x96xf32> to vector<2x96xf32>
    %93 = arith.addf %91, %92 : vector<2x96xf32>
    %94 = vector.extract_strided_slice %93 {offsets = [0, 0], sizes = [2, 32], strides = [1, 1]} : vector<2x96xf32> to vector<2x32xf32>
    %95 = vector.extract_strided_slice %23 {offsets = [0, 0], sizes = [2, 32], strides = [1, 1]} : vector<2x96xf32> to vector<2x32xf32>
    %96 = arith.addf %94, %95 : vector<2x32xf32>
    %cst_39 = arith.constant 0.000000e+00 : f32
    %97 = vector.broadcast %cst_39 : f32 to vector<2x32xf32>
    %98 = arith.subf %97, %96 : vector<2x32xf32>
    %99 = math.exp %98 : vector<2x32xf32>
    %cst_40 = arith.constant 1.000000e+00 : f32
    %100 = vector.broadcast %cst_40 : f32 to vector<2x32xf32>
    %101 = arith.addf %100, %99 : vector<2x32xf32>
    %cst_41 = arith.constant 1.000000e+00 : f32
    %102 = vector.broadcast %cst_41 : f32 to vector<2x32xf32>
    %103 = arith.divf %102, %101 : vector<2x32xf32>
    %104 = vector.extract_strided_slice %93 {offsets = [0, 32], sizes = [2, 32], strides = [1, 1]} : vector<2x96xf32> to vector<2x32xf32>
    %105 = vector.extract_strided_slice %23 {offsets = [0, 32], sizes = [2, 32], strides = [1, 1]} : vector<2x96xf32> to vector<2x32xf32>
    %106 = arith.addf %104, %105 : vector<2x32xf32>
    %cst_42 = arith.constant 0.000000e+00 : f32
    %107 = vector.broadcast %cst_42 : f32 to vector<2x32xf32>
    %108 = arith.subf %107, %106 : vector<2x32xf32>
    %109 = math.exp %108 : vector<2x32xf32>
    %cst_43 = arith.constant 1.000000e+00 : f32
    %110 = vector.broadcast %cst_43 : f32 to vector<2x32xf32>
    %111 = arith.addf %110, %109 : vector<2x32xf32>
    %cst_44 = arith.constant 1.000000e+00 : f32
    %112 = vector.broadcast %cst_44 : f32 to vector<2x32xf32>
    %113 = arith.divf %112, %111 : vector<2x32xf32>
    %114 = vector.extract_strided_slice %93 {offsets = [0, 64], sizes = [2, 32], strides = [1, 1]} : vector<2x96xf32> to vector<2x32xf32>
    %115 = vector.extract_strided_slice %23 {offsets = [0, 64], sizes = [2, 32], strides = [1, 1]} : vector<2x96xf32> to vector<2x32xf32>
    %116 = arith.mulf %103, %115 : vector<2x32xf32>
    %117 = arith.addf %114, %116 : vector<2x32xf32>
    %118 = math.tanh %117 : vector<2x32xf32>
    %cst_45 = arith.constant 1.000000e+00 : f32
    %119 = vector.broadcast %cst_45 : f32 to vector<2x32xf32>
    %120 = arith.subf %119, %113 : vector<2x32xf32>
    %121 = arith.mulf %120, %118 : vector<2x32xf32>
    %122 = arith.mulf %113, %3 : vector<2x32xf32>
    %123 = arith.addf %121, %122 : vector<2x32xf32>
    %cst_46 = arith.constant dense<0.000000e+00> : vector<2x32xf32>
    %124 = tpu.matmul %123, %12, %cst_46 {dimension_numbers = #tpu.dot_dimension_numbers<[1], [0], [0], [1], [0, 0, 1, 1], [], []>} : vector<2x32xf32>, vector<32x32xf32>, vector<2x32xf32> -> vector<2x32xf32>
    %125 = arith.addf %124, %57 : vector<2x32xf32>
    %126 = math.tanh %125 : vector<2x32xf32>
    %cst_47 = arith.constant dense<0.000000e+00> : vector<2x128xf32>
    %127 = tpu.matmul %126, %13, %cst_47 {dimension_numbers = #tpu.dot_dimension_numbers<[1], [0], [0], [1], [0, 0, 1, 1], [], []>} : vector<2x32xf32>, vector<32x128xf32>, vector<2x128xf32> -> vector<2x128xf32>
    %128 = vector.broadcast %18 : vector<1x128xf32> to vector<2x128xf32>
    %129 = arith.addf %127, %128 : vector<2x128xf32>
    %cst_48 = arith.constant 0.000000e+00 : f32
    %130 = vector.broadcast %cst_48 : f32 to vector<2x64xf32>
    %131 = tpu.concatenate %129, %90, %123, %130 in 1 : vector<2x128xf32>, vector<2x32xf32>, vector<2x32xf32>, vector<2x64xf32> -> vector<2x256xf32>
    %c0_49 = arith.constant 0 : index
    %c0_50 = arith.constant 0 : index
    %132 = vector.load %arg5[%c0_49, %c0_50] : memref<2x256xf32, #tpu.memory_space<vmem>>, vector<2x256xf32>
    tpu.vector_store %arg5[%c0_49, %c0_50], %131 {strides = array<i32>} : memref<2x256xf32, #tpu.memory_space<vmem>>, vector<2x256xf32>,
    return
  }
}

</mosaic_0001>

<bundles_post_ra>
// kernel: attn_decoder_forward.1
= control target key start
LH: loop header
LB: loop body
LE: loop exit
PB: predicated region body
PF: predicated region fallthrough
CT: control target
= control target key end

     0   :  { %10 = vsyncpa [#allocation3], 0  ;;  %s582_s21 = smov [#allocation2]   ;;  %s583_s23 = smov 128   ;;  %s700_s0 = inlined_call_operand.vmem [shape: f32[2,32], index: 0, kind: input, shape index: {}]   ;;  %s701_s1 = inlined_call_operand.vmem [shape: f32[2,64], index: 1, kind: input, shape index: {}]   ;;  %s702_s2 = inlined_call_operand.vmem [shape: f32[2,8,32], index: 2, kind: input, shape index: {}]   ;;  %s703_s3 = inlined_call_operand.vmem [shape: f32[2,8], index: 3, kind: input, shape index: {}]   ;;  %s704_s4 = inlined_call_operand.hbm [shape: f32[264,128], index: 4, kind: input, shape index: {}]   ;;  %s705_s5 = inlined_call_operand.vmem [shape: f32[2,256], index: 5, kind: output, shape index: {}]  }
   0x1   :  { %s23_s20 = sshll.u32 %s704_s4, 4  ;;  %s25_s22 = sshll.u32 %s582_s21, 4  ;;  %s24_s20 = int_to_ptr.hbm [resolvable:$true] %s23_s20  ;;  %s26_s22 = int_to_ptr.vmem [resolvable:$true] %s25_s22 }
   0x2   :  { %s584_s24 = smov 8  }
   0x3   :  { %31 = dma.hbm_to_vmem [thread:$0]  %s24_s20, 4224, %s26_s22, [#allocation3], %s583_s23, %s583_s23, %s584_s24  }
   0x4   :  { %580 = dma.done.wait [#allocation3], 4224  }
   0x5   :  { %581 = vsyncadd [#allocation3], 4294963072  ;;  %v625_v0 = vld [vmem:[%s701_s1] sm:$0x3]  ;;  %v48_v1 = vld [vmem:[#allocation2 + $0x38] sm:$0xff]  ;;  %s585_s27 = smov 96   ;;  %v160_v18 = vlaneseq }
   0x6   :  { %v47_v2 = vld [vmem:[#allocation2 + $0x30] sm:$0xff]  ;;  %81 = vrot.lane.b32.xlu0 %v625_v0, %s585_s27  ;;  %98 = vmatpush.msra.mxu0 %v48_v1  ;;  %v46_v3 = vld [vmem:[#allocation2 + $0x28] sm:$0xff]  ;;  %v45_v4 = vld [vmem:[#allocation2 + $0x20] sm:$0xff]  ;;  %vm83_vm0 = vcmask 261120   ;;  %s586_s30 = smov 32   ;;  %v587_v36 = vmov 0  }
   0x7   :  { %v44_v5 = vld [vmem:[#allocation2 + $0x18] sm:$0xff]  ;;  %v43_v6 = vld [vmem:[#allocation2 + $0x10] sm:$0xff]  ;;  %v42_v7 = vld [vmem:[#allocation2 + $0x8] sm:$0xff]  ;;  %v161_v19 = vshrl.u32 %v160_v18, 7  ;;  %525 = vset.pattern.permute.xlu1 %v587_v36  ;;  %v186_v43 = vand.u32 127, %v160_v18  ;;  %vm189_vm1 = vcmask 1041409  }
   0x8   :  { %99 = vmatpush.msra.mxu0 %v47_v2  ;;  %124 = vmatpush.msra.mxu1 %v44_v5  ;;  %v41_v8 = vld [vmem:[#allocation2] sm:$0xff]  ;;  %v639_v10 = vld [vmem:[%s702_s2 + $0x8] sm:$0xff]  ;;  %vm192_vm2 = vcmask 58368   ;;  %v60_v2 = vld [vmem:[#allocation2 + $0x98] sm:$0xff]  ;;  %s588_s8 = smov 64   ;;  %vm491_vm11 = vcmask 523264  }
   0x9   :  { %v632_v9 = vld [vmem:[%s702_s2] sm:$0xff]  ;;  %522 = vset.pattern.permute.xlu0 %v161_v19  ;;  %521 = vset.pattern.permute.xlu2 %v161_v19  ;;  %v50_v18 = vld [vmem:[#allocation2 + $0x48] sm:$0xff]  ;;  %v55_v19 = vld [vmem:[#allocation2 + $0x70] sm:$0xff]  ;;  %vm496_vm12 = vcmask 1041408  }
   0xa   :  { %100 = vmatpush.msra.mxu0 %v46_v3  ;;  %125 = vmatpush.msra.mxu1 %v43_v6  ;;  %v526_v12 = vld [vmem:[#allocation2 + $0x100] ss:$0 sm:$0xff]  ;;  %v527_v28 = vld [vmem:[#allocation2 + $0x105] ss:$0 sm:$0xff]  ;;  %v59_v3 = vld [vmem:[#allocation2 + $0x90] sm:$0xff] }
   0xb   :  { %v40_v20 = vld [vmem:[%s703_s3] sm:$0x3] }
   0xc   :  { %101 = vmatpush.msra.mxu0 %v45_v4  ;;  %126 = vmatpush.msra.mxu1 %v42_v7  ;;  %v166_v21 = vperm.slane %v40_v20, 1  ;;  %v159_v35 = vperm.slane %v40_v20, 0  ;;  %v58_v4 = vld [vmem:[#allocation2 + $0x88] sm:$0xff]  ;;  %v57_v5 = vld [vmem:[#allocation2 + $0x80] sm:$0xff] }
   0xd   :  { %v49_v20 = vld [vmem:[#allocation2 + $0x40] sm:$0xff] }
   0xe   :  { %127 = vmatpush.msra.mxu1 %v41_v8  ;;  %321 = vmatpush.msrb.mxu0 %v60_v2 }
   0xf   :  { %506 = vmatmul.msk.f32.vlgmr.msra.gmra.mxu1 %vm83_vm0, %v632_v9 }
  0x10   :  { %322 = vmatpush.msrb.mxu0 %v59_v3 }
  0x12   :  { %323 = vmatpush.msrb.mxu0 %v58_v4 }
  0x14   :  { %324 = vmatpush.msrb.mxu0 %v57_v5 }
  0x17   :  { %507 = vmatmul.msk.f32.gmra.mxu1 %vm83_vm0, %v639_v10 }
  0x78   :  { %v82_v11 = vpop.permute.xlu0 %81 }
  0x79   :  { %505 = vmatmul.msk.f32.vlgmr.msra.gmra.mxu0 %vm83_vm0, %v82_v11 }
  0x81   :  { %510 = vmatmul.msk.f32.vlgmr.msrb.gmra.mxu0 %vm83_vm0, %v625_v0 }
  0x8c   :  { %v129_v22 = vpop.f32.mrf.mxu1 }
  0x94   :  { %v132_v24 = vpop.f32.mrf.mxu1 }
  0xf6   :  { %v103_v13 = vpop.f32.mrf.mxu0 }
  0xf7   :  { %v644_v14 = vadd.f32 %v526_v12, %v103_v13 }
  0xf9   :  { %v137_v15 = vperm.slane %v644_v14, 0  ;;  %v136_v16 = vrot.slane %v644_v14, 1 }
  0xfb   :  { %139 = vrot.lane.b32.xlu0 %v137_v15, %s586_s30  ;;  %v138_v17 = vperm.slane %v136_v16, 0  ;;  %v52_v15 = vld [vmem:[#allocation2 + $0x58] sm:$0xff]  ;;  %v51_v16 = vld [vmem:[#allocation2 + $0x50] sm:$0xff] }
  0xfc   :  { %274 = vmatpush.msra.mxu2 %v52_v15 }
  0xfd   :  { %141 = vrot.lane.b32.xlu1 %v138_v17, %s586_s30  ;;  %v56_v17 = vld [vmem:[#allocation2 + $0x78] sm:$0xff] }
  0xfe   :  { %275 = vmatpush.msra.mxu2 %v51_v16  ;;  %297 = vmatpush.msra.mxu3 %v56_v17 }
 0x100   :  { %276 = vmatpush.msra.mxu2 %v50_v18  ;;  %298 = vmatpush.msra.mxu3 %v55_v19 }
 0x102   :  { %277 = vmatpush.msra.mxu2 %v49_v20  ;;  %v530_v20 = vld [vmem:[#allocation2 + $0x103] ss:$0 sm:$0xff] }
 0x103   :  { %171 = vperm.xlu0 %522, %v166_v21   ;;  %v54_v21 = vld [vmem:[#allocation2 + $0x68] sm:$0xff] }
 0x104   :  { %299 = vmatpush.msra.mxu3 %v54_v21 }
 0x10b   :  { %523 = vset.pattern.permute.xlu0 %v587_v36 }
 0x16d   :  { %v140_v23 = vpop.permute.xlu0 %139 }
 0x16e   :  { %v145_v25 = vadd.f32 %v140_v23, %v129_v22  ;;  %v53_v23 = vld [vmem:[#allocation2 + $0x60] sm:$0xff] }
 0x16f   :  { %v142_v26 = vpop.permute.xlu1 %141  ;;  %300 = vmatpush.msra.mxu3 %v53_v23 }
 0x170   :  { %532 = vtanh.f32 %v145_v25  ;;  %v146_v27 = vadd.f32 %v142_v26, %v132_v24  ;;  %v36_v24 = vld [vmem:[%s700_s0] sm:$0x3]  ;;  %v528_v25 = vld [vmem:[#allocation2 + $0x102] ss:$0 sm:$0xff] }
 0x171   :  { %509 = vmatmul.msk.f32.vlgmr.msra.gmra.mxu3 %vm83_vm0, %v36_v24 }
 0x172   :  { %534 = vtanh.f32 %v146_v27  ;;  %v326_v27 = vpop.f32.mrf.mxu0 }
 0x175   :  { %v172_v37 = vpop.permute.xlu0 %171 }
 0x176   :  { %v533_v29 = vpop.eup %532 }
 0x177   :  { %v150_v30 = vmul.f32 %v533_v29, %v527_v28 }
 0x178   :  { %v535_v31 = vpop.eup %534 }
 0x179   :  { %v152_v32 = vsel %vm83_vm0, %v150_v30, 0.0  ;;  %v151_v33 = vmul.f32 %v535_v31, %v527_v28  ;;  %v327_v28 = vadd.f32 %v528_v25, %v326_v27 }
 0x17a   :  { %153 = vadd.xlane.f32.xlu1 %v152_v32 }
 0x17b   :  { %v155_v34 = vsel %vm83_vm0, %v151_v33, 0.0 }
 0x17c   :  { %156 = vadd.xlane.f32.xlu2 %v155_v34 }
 0x194   :  { %164 = vperm.xlu2 %521, %v159_v35  }
 0x19c   :  { %524 = vset.pattern.permute.xlu2 %v587_v36 }
 0x1ed   :  { %v154_v40 = vpop.xlane.xlu1 %153 }
 0x1ef   :  { %v157_v38 = vpop.xlane.xlu2 %156 }
 0x1f0   :  { %v176_v39 = vadd.f32 %v172_v37, %v157_v38 }
 0x1f2   :  { %183 = vperm.xlu2 %524, %v176_v39  }
 0x1f7   :  { %v165_v41 = vpop.permute.xlu2 %164 }
 0x1f8   :  { %v175_v42 = vadd.f32 %v165_v41, %v154_v40 }
 0x1fa   :  { %180 = vperm.xlu0 %523, %v175_v42  }
 0x24c   :  { %v184_v44 = vpop.permute.xlu2 %183 }
 0x24d   :  { %v188_v46 = vperm.slane %v184_v44, %v186_v43 }
 0x26c   :  { %v181_v45 = vpop.permute.xlu0 %180 }
 0x26d   :  { %v187_v47 = vperm.slane %v181_v45, %v186_v43  ;;  %v529_v45 = vld [vmem:[#allocation2 + $0x101] ss:$0 sm:$0xff] }
 0x26f   :  { %v190_v48 = vsel %vm189_vm1, %v188_v46, %v187_v47  ;;  %v302_v47 = vpop.f32.mrf.mxu3 }
 0x270   :  { %v193_v49 = vsel %vm192_vm2, %v190_v48, -inf }
 0x271   :  { %194 = vmax.xlane.f32.xlu2 %v193_v49 }
 0x2e4   :  { %v195_v50 = vpop.xlane.xlu2 %194 }
 0x2e5   :  { %v197_v51 = vperm.slane %v195_v50, 0  ;;  %v198_v52 = vperm.slane %v195_v50, 1 }
 0x2e7   :  { %v201_v53 = vsub.f32 %v175_v42, %v197_v51  ;;  %v202_v54 = vsub.f32 %v176_v39, %v198_v52 }
 0x2e9   :  { %v203_v55 = vmul.f32 1.442695, %v201_v53  ;;  %v205_v56 = vmul.f32 1.442695, %v202_v54 }
 0x2eb   :  { %536 = vpow2.f32 %v203_v55 }
 0x2ec   :  { %538 = vpow2.f32 %v205_v56 }
 0x2f1   :  { %v537_v57 = vpop.eup %536 }
 0x2f2   :  { %v539_v58 = vpop.eup %538  ;;  %210 = vperm.xlu0 %523, %v537_v57  }
 0x2f3   :  { %213 = vperm.xlu1 %525, %v539_v58  }
 0x364   :  { %v211_v59 = vpop.permute.xlu0 %210 }
 0x365   :  { %v214_v60 = vpop.permute.xlu1 %213  ;;  %v215_v61 = vperm.slane %v211_v59, %v186_v43 }
 0x366   :  { %v216_v62 = vperm.slane %v214_v60, %v186_v43 }
 0x368   :  { %v217_v63 = vsel %vm189_vm1, %v216_v62, %v215_v61 }
 0x369   :  { %v219_v1 = vsel %vm192_vm2, %v217_v63, 0.0 }
 0x36a   :  { %220 = vadd.xlane.f32.xlu0 %v219_v1 }
 0x3dd   :  { %v221_v6 = vpop.xlane.xlu0 %220 }
 0x3de   :  { %540 = vrcp.f32 %v221_v6  ;;  %v64_v6 = vld [vmem:[#allocation2 + $0xb8] sm:$0xff] }
 0x3df   :  { %389 = vmatpush.msrb.mxu2 %v64_v6 }
 0x3e4   :  { %v541_v7 = vpop.eup %540 }
 0x3e5   :  { %v225_v8 = vperm.slane %v541_v7, 1  ;;  %v224_v11 = vperm.slane %v541_v7, 0  ;;  %v63_v7 = vld [vmem:[#allocation2 + $0xb0] sm:$0xff] }
 0x3e6   :  { %390 = vmatpush.msrb.mxu2 %v63_v7 }
 0x3e7   :  { %v229_v12 = vmul.f32 %v539_v58, %v225_v8  ;;  %v228_v13 = vmul.f32 %v537_v57, %v224_v11  ;;  %v62_v8 = vld [vmem:[#allocation2 + $0xa8] sm:$0xff]  ;;  %v61_v11 = vld [vmem:[#allocation2 + $0xa0] sm:$0xff] }
 0x3e8   :  { %391 = vmatpush.msrb.mxu2 %v62_v8 }
 0x3e9   :  { %237 = vperm.xlu2 %524, %v229_v12   ;;  %232 = vperm.xlu1 %525, %v228_v13  }
 0x3ea   :  { %392 = vmatpush.msrb.mxu2 %v61_v11 }
 0x3f1   :  { %350 = vrot.lane.b32.xlu1 %v327_v28, %s588_s8 }
 0x443   :  { %v238_v22 = vpop.permute.xlu2 %237 }
 0x444   :  { %v241_v26 = vmul.f32 %v238_v22, %v639_v10 }
 0x446   :  { %v249_v29 = vsel %vm83_vm0, %v241_v26, 0.0 }
 0x447   :  { %v250_v30 = vrot.slane %v249_v29, 4 }
 0x449   :  { %v251_v31 = vadd.f32 %v250_v30, %v249_v29 }
 0x44b   :  { %v252_v34 = vrot.slane %v251_v31, 2 }
 0x44d   :  { %v253_v37 = vadd.f32 %v252_v34, %v251_v31 }
 0x44f   :  { %v254_v39 = vrot.slane %v253_v37, 1 }
 0x451   :  { %v255_v43 = vadd.f32 %v254_v39, %v253_v37 }
 0x45b   :  { %v233_v32 = vpop.permute.xlu1 %232 }
 0x45c   :  { %v240_v33 = vmul.f32 %v233_v32, %v632_v9 }
 0x45e   :  { %v242_v35 = vsel %vm83_vm0, %v240_v33, 0.0 }
 0x45f   :  { %v243_v36 = vrot.slane %v242_v35, 4 }
 0x461   :  { %v244_v10 = vadd.f32 %v243_v36, %v242_v35 }
 0x463   :  { %v245_v38 = vrot.slane %v244_v10, 2  ;;  %v351_v61 = vpop.permute.xlu1 %350 }
 0x465   :  { %v246_v40 = vadd.f32 %v245_v38, %v244_v10 }
 0x467   :  { %v247_v41 = vrot.slane %v246_v40, 1 }
 0x469   :  { %v248_v42 = vadd.f32 %v247_v41, %v246_v40  ;;  %v68_v41 = vld [vmem:[#allocation2 + $0xd8] sm:$0xff] }
 0x46a   :  { %456 = vmatpush.msrb.mxu3 %v68_v41 }
 0x46b   :  { %v259_v44 = vsel %vm189_vm1, %v255_v43, %v248_v42  ;;  %v67_v42 = vld [vmem:[#allocation2 + $0xd0] sm:$0xff]  ;;  %v66_v43 = vld [vmem:[#allocation2 + $0xc8] sm:$0xff] }
 0x46c   :  { %508 = vmatmul.msk.f32.vlgmr.msra.gmra.mxu2 %vm83_vm0, %v259_v44  ;;  %457 = vmatpush.msrb.mxu3 %v67_v42  ;;  %v65_v44 = vld [vmem:[#allocation2 + $0xc0] sm:$0xff] }
 0x46e   :  { %458 = vmatpush.msrb.mxu3 %v66_v43 }
 0x470   :  { %459 = vmatpush.msrb.mxu3 %v65_v44 }
 0x4ef   :  { %v279_v46 = vpop.f32.mrf.mxu2 }
 0x4f0   :  { %v672_v9 = vadd.f32 %v529_v45, %v279_v46 }
 0x4f2   :  { %v305_v48 = vadd.f32 %v302_v47, %v672_v9 }
 0x4f4   :  { %v329_v49 = vadd.f32 %v327_v28, %v305_v48 }
 0x4f6   :  { %v330_v50 = vsub.f32 0.0, %v329_v49 }
 0x4f8   :  { %v331_v51 = vmul.f32 1.442695, %v330_v50  ;;  %v72_v50 = vld [vmem:[#allocation2 + $0xf8] sm:$0xff] }
 0x4f9   :  { %481 = vmatpush.msra.mxu0 %v72_v50 }
 0x4fa   :  { %542 = vpow2.f32 %v331_v51  ;;  %v71_v51 = vld [vmem:[#allocation2 + $0xf0] sm:$0xff] }
 0x4fb   :  { %482 = vmatpush.msra.mxu0 %v71_v51 }
 0x500   :  { %v543_v52 = vpop.eup %542 }
 0x501   :  { %v333_v53 = vadd.f32 1.0, %v543_v52  ;;  %v70_v52 = vld [vmem:[#allocation2 + $0xe8] sm:$0xff] }
 0x502   :  { %483 = vmatpush.msra.mxu0 %v70_v52 }
 0x503   :  { %544 = vrcp.f32 %v333_v53  ;;  %v345_v57 = vand.u32 2147483648, %v333_v53  ;;  %v343_v59 = vand.u32 2147483647, %v333_v53  ;;  %vm339_vm4 = vweird.f32 %v333_v53 }
 0x505   :  { %v346_v62 = vor.u32 1.1754944e-38, %v345_v57  ;;  %vm344_vm6 = vcmp.eq.f32.partialorder %v343_v59, 8.507059e+37 }
 0x509   :  { %v545_v54 = vpop.eup %544 }
 0x50a   :  { %v335_v55 = vmul.f32 %v545_v54, %v333_v53  ;;  %vm340_vm3 = vweird.f32 %v545_v54  ;;  %v69_v53 = vld [vmem:[#allocation2 + $0xe0] sm:$0xff] }
 0x50b   :  { %vm341_vm5 = vmor %vm339_vm4, %vm340_vm3  ;;  %484 = vmatpush.msra.mxu0 %v69_v53 }
 0x50c   :  { %v336_v56 = vsub.f32 1.0, %v335_v55 }
 0x50e   :  { %v337_v58 = vmul.f32 %v545_v54, %v336_v56 }
 0x510   :  { %v338_v60 = vadd.f32 %v545_v54, %v337_v58  ;;  %v531_v58 = vld [vmem:[#allocation2 + $0x104] ss:$0 sm:$0xff] }
 0x512   :  { %v342_v63 = vsel %vm341_vm5, %v545_v54, %v338_v60 }
 0x513   :  { %v347_v1 = vsel %vm344_vm6, %v346_v62, %v342_v63 }
 0x514   :  { %v353_v2 = vmul.f32 %v351_v61, %v347_v1  ;;  %v360_v13 = vsub.f32 1.0, %v347_v1 }
 0x516   :  { %355 = vrot.lane.b32.xlu1 %v353_v2, %s588_s8 }
 0x51e   :  { %366 = vrot.lane.b32.xlu1 %v625_v0, %s586_s30 }
 0x526   :  { %417 = vrot.lane.b32.xlu1 %v644_v14, %s588_s8 }
 0x588   :  { %v356_v3 = vpop.permute.xlu1 %355 }
 0x589   :  { %v358_v4 = vadd.f32 %v356_v3, %v305_v48 }
 0x58b   :  { %546 = vtanh.f32 %v358_v4 }
 0x590   :  { %v367_v12 = vpop.permute.xlu1 %366 }
 0x591   :  { %v547_v5 = vpop.eup %546  ;;  %v369_v16 = vmul.f32 %v367_v12, %v347_v1 }
 0x592   :  { %362 = vrot.lane.b32.xlu0 %v547_v5, %s585_s27 }
 0x604   :  { %v363_v15 = vpop.permute.xlu0 %362 }
 0x605   :  { %v365_v17 = vmul.f32 %v363_v15, %v360_v13 }
 0x607   :  { %v370_v18 = vadd.f32 %v369_v16, %v365_v17 }
 0x609   :  { %373 = vrot.lane.b32.xlu2 %v370_v18, %s585_s27 }
 0x663   :  { %v682_v19 = vpop.permute.xlu2 %373 }
 0x664   :  { %511 = vmatmul.msk.f32.vlgmr.msrb.gmra.mxu2 %vm83_vm0, %v682_v19 }
 0x6e7   :  { %v394_v21 = vpop.f32.mrf.mxu2 }
 0x6e8   :  { %v395_v22 = vadd.f32 %v530_v20, %v394_v21 }
 0x6ea   :  { %v397_v23 = vadd.f32 %v395_v22, %v644_v14  ;;  %v418_v14 = vpop.permute.xlu1 %417 }
 0x6ec   :  { %v398_v24 = vsub.f32 0.0, %v397_v23 }
 0x6ee   :  { %v399_v25 = vmul.f32 1.442695, %v398_v24 }
 0x6f0   :  { %548 = vpow2.f32 %v399_v25 }
 0x6f6   :  { %v549_v26 = vpop.eup %548 }
 0x6f7   :  { %v401_v27 = vadd.f32 1.0, %v549_v26 }
 0x6f9   :  { %550 = vrcp.f32 %v401_v27  ;;  %v413_v31 = vand.u32 2147483648, %v401_v27  ;;  %v411_v33 = vand.u32 2147483647, %v401_v27  ;;  %vm407_vm8 = vweird.f32 %v401_v27 }
 0x6fb   :  { %v414_v35 = vor.u32 1.1754944e-38, %v413_v31  ;;  %vm412_vm10 = vcmp.eq.f32.partialorder %v411_v33, 8.507059e+37 }
 0x6ff   :  { %v551_v28 = vpop.eup %550 }
 0x700   :  { %v403_v29 = vmul.f32 %v551_v28, %v401_v27  ;;  %vm408_vm7 = vweird.f32 %v551_v28 }
 0x701   :  { %vm409_vm9 = vmor %vm407_vm8, %vm408_vm7 }
 0x702   :  { %v404_v30 = vsub.f32 1.0, %v403_v29 }
 0x704   :  { %v405_v32 = vmul.f32 %v551_v28, %v404_v30 }
 0x706   :  { %v406_v34 = vadd.f32 %v551_v28, %v405_v32 }
 0x708   :  { %v410_v36 = vsel %vm409_vm9, %v551_v28, %v406_v34 }
 0x709   :  { %v415_v37 = vsel %vm412_vm10, %v414_v35, %v410_v36 }
 0x70a   :  { %v420_v10 = vmul.f32 %v418_v14, %v415_v37  ;;  %v427_v45 = vsub.f32 1.0, %v415_v37  ;;  %v433_v47 = vmul.f32 %v415_v37, %v625_v0 }
 0x70c   :  { %422 = vrot.lane.b32.xlu2 %v420_v10, %s588_s8 }
 0x714   :  { %439 = vrot.lane.b32.xlu2 %v672_v9, %s586_s30 }
 0x766   :  { %v423_v38 = vpop.permute.xlu2 %422 }
 0x767   :  { %v425_v39 = vadd.f32 %v423_v38, %v395_v22 }
 0x769   :  { %552 = vtanh.f32 %v425_v39 }
 0x76e   :  { %v440_v54 = vpop.permute.xlu2 %439 }
 0x76f   :  { %v553_v40 = vpop.eup %552 }
 0x770   :  { %429 = vrot.lane.b32.xlu1 %v553_v40, %s585_s27 }
 0x7e2   :  { %v430_v46 = vpop.permute.xlu1 %429 }
 0x7e3   :  { %v432_v48 = vmul.f32 %v430_v46, %v427_v45 }
 0x7e5   :  { %v434_v9 = vadd.f32 %v433_v47, %v432_v48 }
 0x7e7   :  { %436 = vrot.lane.b32.xlu0 %v434_v9, %s585_s27  ;;  %v490_v57 = vsel %vm83_vm0, %v682_v19, %v434_v9 }
 0x7e8   :  { %v492_v59 = vsel %vm491_vm11, %v490_v57, 0.0 }
 0x7e9   :  { %v495_v61 = vrot.slane %v492_v59, 6 }
 0x859   :  { %v437_v49 = vpop.permute.xlu0 %436 }
 0x85a   :  { %512 = vmatmul.msk.f32.vlgmr.msrb.gmra.mxu3 %vm83_vm0, %v437_v49 }
 0x8dd   :  { %v461_v55 = vpop.f32.mrf.mxu3 }
 0x8de   :  { %v462_v56 = vadd.f32 %v461_v55, %v440_v54 }
 0x8e0   :  { %554 = vtanh.f32 %v462_v56 }
 0x8e6   :  { %v555_v0 = vpop.eup %554 }
 0x8e7   :  { %513 = vmatmul.msk.f32.vlgmr.msra.gmra.mxu0 %vm83_vm0, %v555_v0 }
 0x964   :  { %v486_v60 = vpop.f32.mrf.mxu0 }
 0x965   :  { %v487_v62 = vadd.f32 %v531_v58, %v486_v60 }
 0x967   :  { %v497_v63 = vsel %vm496_vm12, %v487_v62, %v495_v61 }
 0x968   :  { %499 = vst [vmem:[%s705_s5] sm:$0xf] %v497_v63 }
 0x969   :  { %504 = vsyncpa [#allocation3], 1 }

</bundles_post_ra>
